<compile_context>
chip_gen: v5e
topology: v5e:2x2
jax: 0.10.0
libtpu: 0.0.40
codegen_flags: <defaults>
</compile_context>

<pallas_src>
import functools
import math

import jax
import jax.numpy as jnp
import numpy as np
from jax.experimental import pallas as pl
from jax.experimental.pallas import tpu as pltpu

LN_EPS = 1e-5


def _layer_norm(x, gamma, beta):
    mu = jnp.mean(x, axis=-1, keepdims=True)
    var = jnp.mean(jnp.square(x - mu), axis=-1, keepdims=True)
    return (x - mu) * jax.lax.rsqrt(var + LN_EPS) * gamma + beta


def _gelu(x):
    # tanh-approximate GELU (EUP-friendly); the in-script reference uses the same formula.
    c = math.sqrt(2.0 / math.pi)
    return 0.5 * x * (1.0 + jnp.tanh(c * (x + 0.044715 * x * x * x)))


def psum_kernel(x_ref, mask_ref,
                wqkv_ref, bqkv_ref, wao_ref, wi_ref, wo_ref,
                vec_ref, bi_ref, wc_ref, bc_ref,
                out_ref,
                ctx_ref,
                *, num_heads, count):
    c = pl.program_id(1)                       # layer index (innermost reduction axis)

    tb, s, h = x_ref.shape                     # (TB, S, H) batch chunk
    dh = h // num_heads

    x_bf = x_ref[...]                          # (TB, S, H) bf16
    x2 = x_bf.reshape(tb * s, h)
    x_f32 = x2.astype(jnp.float32)
    mask = mask_ref[...]                       # (TB, 1, S) additive mask, f32

    vec = vec_ref[...]                         # (6, H): bao, g1, be1, bo, g2, be2
    bao, g1, be1 = vec[0:1], vec[1:2], vec[2:3]
    bo, g2, be2 = vec[3:4], vec[4:5], vec[5:6]

    # ---- fused QKV projection: one (H,3H) MXU matmul, bf16 x bf16 -> f32 acc --------
    #      (1/sqrt(dh) already folded into the q columns of wqkv / bqkv wrapper-side)
    qkv = jnp.dot(x2, wqkv_ref[...], preferred_element_type=jnp.float32) + bqkv_ref[...]
    qkv = qkv.reshape(tb, s, 3 * h)
    q = qkv[:, :, :h].astype(jnp.bfloat16)
    k = qkv[:, :, h:2 * h].astype(jnp.bfloat16)
    v = qkv[:, :, 2 * h:].astype(jnp.bfloat16)

    # ---- attention: each head batched over the TB chunk, context collected into one
    #      VMEM buffer so the output projection is a single K=H matmul ----------------
    for hd in range(num_heads):
        sl = slice(hd * dh, (hd + 1) * dh)
        scores = jnp.einsum('bqd,bkd->bqk', q[:, :, sl], k[:, :, sl],
                            preferred_element_type=jnp.float32) + mask
        m = jnp.max(scores, axis=-1, keepdims=True)
        e = jnp.exp(scores - m)
        inv = pl.reciprocal(jnp.sum(e, axis=-1, keepdims=True), approx=True)
        probs = (e * inv).astype(jnp.bfloat16)
        ctx_ref[:, :, sl] = jnp.einsum('bqk,bkd->bqd', probs, v[:, :, sl],
                                       preferred_element_type=jnp.float32)

    ctx = ctx_ref[...].reshape(tb * s, h).astype(jnp.bfloat16)
    attn = jnp.dot(ctx, wao_ref[...], preferred_element_type=jnp.float32) + bao
    h1 = _layer_norm(attn + x_f32, g1, be1)

    # ---- feed-forward (intermediate held bf16 right after GELU) ----------------------
    inter = _gelu(jnp.dot(h1.astype(jnp.bfloat16), wi_ref[...],
                          preferred_element_type=jnp.float32) + bi_ref[...]
                  ).astype(jnp.bfloat16)
    ffn = jnp.dot(inter, wo_ref[...], preferred_element_type=jnp.float32) + bo
    h2 = _layer_norm(ffn + h1, g2, be2)

    # ---- shared classifier (lane-padded) + running average over the `count` layers ---
    logits = jnp.dot(h2.astype(jnp.bfloat16), wc_ref[...],
                     preferred_element_type=jnp.float32) + bc_ref[...]
    logits = logits.reshape(tb, s, -1)

    @pl.when(c == 0)
    def _init():
        out_ref[...] = jnp.zeros_like(out_ref)

    out_ref[...] += logits

    @pl.when(c == count - 1)
    def _finalize():
        out_ref[...] = out_ref[...] * (1.0 / count)


def psum_avg_logits(layers, attention_mask, params, *, num_heads,
                    batch_tile=None, single_buffer_ffn=False):
    """PSUM.forward(layers, attention_mask) -> avg_logits  (return_output=False)."""
    count = params['wq'].shape[0]
    B, S, H = layers[0].shape
    I = params['wi'].shape[-1]
    NL = params['wc'].shape[-1]
    NLp = ((NL + 127) // 128) * 128            # lane-dense classifier / output
    dh = H // num_heads
    scale = 1.0 / math.sqrt(dh)

    if batch_tile is None:
        # Amortize the per-layer weight DMA over several sequences. TB must divide B;
        # shrink TB on v7x (64 MiB VMEM), grow on v6e/v5e (128 MiB).
        batch_tile = next(tbc for tbc in (8, 4, 2, 1) if B % tbc == 0)
    TB = batch_tile
    assert B % TB == 0, "batch_tile must divide the batch size"

    # -------- one-time wrapper-side weight packing -------------------------------------
    wqkv = jnp.concatenate([params['wq'] * scale, params['wk'], params['wv']],
                           axis=-1).astype(jnp.bfloat16)            # (count, H, 3H)
    bqkv = jnp.concatenate([params['bq'] * scale, params['bk'], params['bv']],
                           axis=-1).astype(jnp.float32)             # (count, 1, 3H)
    vec6 = jnp.concatenate([params['bao'], params['g1'], params['be1'],
                            params['bo'], params['g2'], params['be2']],
                           axis=1).astype(jnp.float32)              # (count, 6, H)
    bi = params['bi'].astype(jnp.float32)                           # (count, 1, I)
    wao = params['wao'].astype(jnp.bfloat16)                        # (count, H, H)
    wi = params['wi'].astype(jnp.bfloat16)                          # (count, H, I)
    wo = params['wo'].astype(jnp.bfloat16)                          # (count, I, H)
    wc_pad = jnp.zeros((H, NLp), jnp.float32).at[:, :NL].set(
        params['wc']).astype(jnp.bfloat16)                          # (H, NLp) lane-dense
    bc_pad = jnp.zeros((1, NLp), jnp.float32).at[:, :NL].set(params['bc'])

    # pre_layers[i] consumes layers[-i-1]; stack exactly those, bf16 for HBM traffic.
    x_stacked = jnp.stack([layers[-(i + 1)] for i in range(count)]
                          ).astype(jnp.bfloat16)                    # (count, B, S, H)
    mask = attention_mask.reshape(B, 1, S).astype(jnp.float32)

    # Optionally single-buffer the two big FFN matrices (v7x: 64 MiB VMEM budget).
    def ffn_spec(block, index_map):
        if single_buffer_ffn:
            return pl.BlockSpec(block, index_map, pipeline_mode=pl.Buffered(1))
        return pl.BlockSpec(block, index_map)

    in_specs = [
        pl.BlockSpec((None, TB, S, H), lambda b, c: (c, b, 0, 0)),   # hidden states
        pl.BlockSpec((TB, 1, S), lambda b, c: (b, 0, 0)),            # additive mask
        pl.BlockSpec((None, H, 3 * H), lambda b, c: (c, 0, 0)),      # fused wqkv
        pl.BlockSpec((None, 1, 3 * H), lambda b, c: (c, 0, 0)),      # fused bqkv
        pl.BlockSpec((None, H, H), lambda b, c: (c, 0, 0)),          # wao
        ffn_spec((None, H, I), lambda b, c: (c, 0, 0)),              # wi
        ffn_spec((None, I, H), lambda b, c: (c, 0, 0)),              # wo
        pl.BlockSpec((None, 6, H), lambda b, c: (c, 0, 0)),          # packed LN/bias vecs
        pl.BlockSpec((None, 1, I), lambda b, c: (c, 0, 0)),          # bi
        pl.BlockSpec((H, NLp), lambda b, c: (0, 0)),                 # classifier weight
        pl.BlockSpec((1, NLp), lambda b, c: (0, 0)),                 # classifier bias
    ]
    out_specs = pl.BlockSpec((TB, S, NLp), lambda b, c: (b, 0, 0))   # resident f32 acc

    # -------- explicit VMEM budget (double-buffered weights + activations) -------------
    per_layer_bytes = 2 * (H * 3 * H + H * H + 2 * H * I) + 4 * (3 * H + 6 * H + I)
    stream_bytes = 2 * TB * S * H + 4 * TB * S
    act_bytes = 4 * TB * S * (3 * H + 2 * H + I // 2 + 2 * S) + 4 * TB * S * NLp
    needed = 2 * (per_layer_bytes + stream_bytes) + act_bytes + (4 << 20)
    try:
        phys_vmem = pltpu.get_tpu_info().vmem_capacity_bytes
    except Exception:
        phys_vmem = 64 << 20
    vmem_limit = int(min(max(needed, 32 << 20), int(phys_vmem * 0.9)))

    kernel = functools.partial(psum_kernel, num_heads=num_heads, count=count)
    grid_spec = pltpu.PrefetchScalarGridSpec(
        num_scalar_prefetch=0,
        grid=(B // TB, count),                 # batch-chunks parallel, layer-sum inner
        in_specs=in_specs,
        out_specs=out_specs,
        scratch_shapes=[pltpu.VMEM((TB, S, H), jnp.float32)],   # per-head ctx buffer
    )
    out = pl.pallas_call(
        kernel,
        out_shape=jax.ShapeDtypeStruct((B, S, NLp), jnp.float32),
        grid_spec=grid_spec,
        compiler_params=pltpu.CompilerParams(
            dimension_semantics=("parallel", "arbitrary"),
            vmem_limit_bytes=vmem_limit),
    )(x_stacked, mask, wqkv, bqkv, wao, wi, wo, vec6, bi, wc_pad, bc_pad)
    return out[:, :, :NL]                      # drop the lane padding


def _reference(layers, attention_mask, params, *, num_heads):
    """Pure-JAX reference of the same forward (mirrors the kernel's cast points)."""
    count = params['wq'].shape[0]
    B, S, H = layers[0].shape
    dh = H // num_heads
    scale = 1.0 / math.sqrt(dh)
    mask = attention_mask.reshape(B, 1, 1, S).astype(jnp.float32)

    def mm(a, w, b):
        return jnp.einsum('bsh,hk->bsk', a.astype(jnp.bfloat16),
                          w.astype(jnp.bfloat16),
                          preferred_element_type=jnp.float32) + b.astype(jnp.float32)

    logitses = []
    for i in range(count):
        x_bf = layers[-(i + 1)].astype(jnp.bfloat16)
        x = x_bf.astype(jnp.float32)
        p = {k: v[i] for k, v in params.items() if k not in ('wc', 'bc')}

        q = mm(x_bf, p['wq'], p['bq'])
        k_ = mm(x_bf, p['wk'], p['bk'])
        v_ = mm(x_bf, p['wv'], p['bv'])

        def heads(t):
            return t.reshape(B, S, num_heads, dh).transpose(0, 2, 1, 3)

        qh, kh, vh = heads(q), heads(k_), heads(v_)
        scores = jnp.einsum('bhqd,bhkd->bhqk',
                            qh.astype(jnp.bfloat16), kh.astype(jnp.bfloat16),
                            preferred_element_type=jnp.float32) * scale + mask
        m = jnp.max(scores, axis=-1, keepdims=True)
        e = jnp.exp(scores - m)
        probs = e / jnp.sum(e, axis=-1, keepdims=True)
        ctx = jnp.einsum('bhqk,bhkd->bhqd',
                         probs.astype(jnp.bfloat16), vh.astype(jnp.bfloat16),
                         preferred_element_type=jnp.float32)
        ctx = ctx.transpose(0, 2, 1, 3).reshape(B, S, H)

        attn = mm(ctx, p['wao'], p['bao'])
        h1 = _layer_norm(attn + x, p['g1'], p['be1'])
        inter = _gelu(mm(h1, p['wi'], p['bi']))
        ffn = mm(inter, p['wo'], p['bo'])
        h2 = _layer_norm(ffn + h1, p['g2'], p['be2'])

        logitses.append(mm(h2, params['wc'], params['bc']))
    return jnp.sum(jnp.stack(logitses), axis=0) / count


if __name__ == "__main__":
    count = 2                       # PSUM(count=2, ...)
    B, S, H = 2, 8, 32              # batch, seq_len, hidden_size
    num_heads = 2                   # head_dim = 16
    I = 4 * H                       # intermediate_size = 128 (lane aligned)
    NL = 2                          # num_labels

    key = jax.random.PRNGKey(0)
    kit = iter(jax.random.split(key, 40))

    def xavier(k, shape):
        fan_in, fan_out = shape[-2], shape[-1]
        bound = math.sqrt(6.0 / (fan_in + fan_out))
        return jax.random.uniform(k, shape, jnp.float32, -bound, bound)

    def stack_w(shape):
        return jnp.stack([xavier(next(kit), shape) for _ in range(count)])

    def stack_b(width, scl=0.05):
        return scl * jax.random.normal(next(kit), (count, 1, width), jnp.float32)

    # Stand-in for the RoBERTa encoder hidden states (external pretrained backbone).
    layers = [0.5 * jax.random.normal(next(kit), (B, S, H), jnp.float32)
              for _ in range(count + 1)]

    # HF-style extended additive attention mask: 0 = attend, -10000 = masked.
    attention_mask = jnp.zeros((B, 1, S), jnp.float32)
    attention_mask = attention_mask.at[1, 0, S - 2:].set(-10000.0)

    params = {
        'wq': stack_w((H, H)), 'bq': stack_b(H),
        'wk': stack_w((H, H)), 'bk': stack_b(H),
        'wv': stack_w((H, H)), 'bv': stack_b(H),
        'wao': stack_w((H, H)), 'bao': stack_b(H),
        'g1': 1.0 + stack_b(H), 'be1': stack_b(H),
        'wi': stack_w((H, I)), 'bi': stack_b(I),
        'wo': stack_w((I, H)), 'bo': stack_b(H),
        'g2': 1.0 + stack_b(H), 'be2': stack_b(H),
        # PSUM.classifier: xavier_uniform weight, bias.uniform_(0, 0) == zeros.
        'wc': xavier(next(kit), (H, NL)),
        'bc': jnp.zeros((1, NL), jnp.float32),
    }

    avg_logits = psum_avg_logits(layers, attention_mask, params, num_heads=num_heads)
    jax.block_until_ready(avg_logits)

    ref = _reference(layers, attention_mask, params, num_heads=num_heads)
    # Tolerance also covers pl.reciprocal(approx=True) and the wrapper-side scale fold.
    np.testing.assert_allclose(np.asarray(avg_logits), np.asarray(ref),
                               rtol=1e-2, atol=1e-2)
    print("KERNEL_OK")
</pallas_src>

<mosaic_0001>
module attributes {stable_mosaic.version = 11 : i64} {
  func.func @psum_kernel(%arg0: i32, %arg1: i32, %arg2: memref<1x2x8x32xbf16, #tpu.memory_space<vmem>>, %arg3: memref<2x1x8xf32, #tpu.memory_space<vmem>>, %arg4: memref<1x32x96xbf16, #tpu.memory_space<vmem>>, %arg5: memref<1x1x96xf32, #tpu.memory_space<vmem>>, %arg6: memref<1x32x32xbf16, #tpu.memory_space<vmem>>, %arg7: memref<1x32x128xbf16, #tpu.memory_space<vmem>>, %arg8: memref<1x128x32xbf16, #tpu.memory_space<vmem>>, %arg9: memref<1x6x32xf32, #tpu.memory_space<vmem>>, %arg10: memref<1x1x128xf32, #tpu.memory_space<vmem>>, %arg11: memref<32x128xbf16, #tpu.memory_space<vmem>>, %arg12: memref<1x128xf32, #tpu.memory_space<vmem>>, %arg13: memref<2x8x128xf32, #tpu.memory_space<vmem>>, %arg14: memref<2x8x32xf32, #tpu.memory_space<vmem>>) attributes {dimension_semantics = [#tpu.dimension_semantics<parallel>, #tpu.dimension_semantics<arbitrary>], iteration_bounds = array<i64: 1, 2>, scalar_prefetch = 0 : i64, scratch_operands = 1 : i64, tpu.core_type = #tpu.core_type<tc>, window_params = [{transform_indices = @transform_0, window_bounds = array<i64: 1, 2, 8, 32>}, {transform_indices = @transform_1, window_bounds = array<i64: 2, 1, 8>}, {transform_indices = @transform_2, window_bounds = array<i64: 1, 32, 96>}, {transform_indices = @transform_3, window_bounds = array<i64: 1, 1, 96>}, {transform_indices = @transform_4, window_bounds = array<i64: 1, 32, 32>}, {transform_indices = @transform_5, window_bounds = array<i64: 1, 32, 128>}, {transform_indices = @transform_6, window_bounds = array<i64: 1, 128, 32>}, {transform_indices = @transform_7, window_bounds = array<i64: 1, 6, 32>}, {transform_indices = @transform_8, window_bounds = array<i64: 1, 1, 128>}, {pipeline_mode = #tpu.pipeline_mode<synchronous>, transform_indices = @transform_9, window_bounds = array<i64: 32, 128>}, {pipeline_mode = #tpu.pipeline_mode<synchronous>, transform_indices = @transform_10, window_bounds = array<i64: 1, 128>}, {transform_indices = @transform_11, window_bounds = array<i64: 2, 8, 128>}]} {
    %c0 = arith.constant 0 : index
    %c0_0 = arith.constant 0 : index
    %c0_1 = arith.constant 0 : index
    %c0_2 = arith.constant 0 : index
    %0 = vector.load %arg2[%c0, %c0_0, %c0_1, %c0_2] : memref<1x2x8x32xbf16, #tpu.memory_space<vmem>>, vector<1x2x8x32xbf16>
    %1 = vector.shape_cast %0 : vector<1x2x8x32xbf16> to vector<2x8x32xbf16>
    %2 = vector.shape_cast %1 : vector<2x8x32xbf16> to vector<16x32xbf16>
    %3 = arith.extf %2 : vector<16x32xbf16> to vector<16x32xf32>
    %c0_3 = arith.constant 0 : index
    %c0_4 = arith.constant 0 : index
    %c0_5 = arith.constant 0 : index
    %4 = vector.load %arg3[%c0_3, %c0_4, %c0_5] : memref<2x1x8xf32, #tpu.memory_space<vmem>>, vector<2x1x8xf32>
    %c0_6 = arith.constant 0 : index
    %c0_7 = arith.constant 0 : index
    %c0_8 = arith.constant 0 : index
    %5 = vector.load %arg9[%c0_6, %c0_7, %c0_8] : memref<1x6x32xf32, #tpu.memory_space<vmem>>, vector<1x6x32xf32>
    %6 = vector.shape_cast %5 : vector<1x6x32xf32> to vector<6x32xf32>
    %7 = vector.extract_strided_slice %6 {offsets = [0, 0], sizes = [1, 32], strides = [1, 1]} : vector<6x32xf32> to vector<1x32xf32>
    %8 = vector.extract_strided_slice %6 {offsets = [1, 0], sizes = [1, 32], strides = [1, 1]} : vector<6x32xf32> to vector<1x32xf32>
    %9 = vector.extract_strided_slice %6 {offsets = [2, 0], sizes = [1, 32], strides = [1, 1]} : vector<6x32xf32> to vector<1x32xf32>
    %10 = vector.extract_strided_slice %6 {offsets = [3, 0], sizes = [1, 32], strides = [1, 1]} : vector<6x32xf32> to vector<1x32xf32>
    %11 = vector.extract_strided_slice %6 {offsets = [4, 0], sizes = [1, 32], strides = [1, 1]} : vector<6x32xf32> to vector<1x32xf32>
    %12 = vector.extract_strided_slice %6 {offsets = [5, 0], sizes = [1, 32], strides = [1, 1]} : vector<6x32xf32> to vector<1x32xf32>
    %c0_9 = arith.constant 0 : index
    %c0_10 = arith.constant 0 : index
    %c0_11 = arith.constant 0 : index
    %13 = vector.load %arg4[%c0_9, %c0_10, %c0_11] : memref<1x32x96xbf16, #tpu.memory_space<vmem>>, vector<1x32x96xbf16>
    %14 = vector.shape_cast %13 : vector<1x32x96xbf16> to vector<32x96xbf16>
    %cst = arith.constant dense<0.000000e+00> : vector<16x96xf32>
    %15 = tpu.matmul %2, %14, %cst {dimension_numbers = #tpu.dot_dimension_numbers<[1], [0], [0], [1], [0, 0, 1, 1], [], []>} : vector<16x32xbf16>, vector<32x96xbf16>, vector<16x96xf32> -> vector<16x96xf32>
    %c0_12 = arith.constant 0 : index
    %c0_13 = arith.constant 0 : index
    %c0_14 = arith.constant 0 : index
    %16 = vector.load %arg5[%c0_12, %c0_13, %c0_14] : memref<1x1x96xf32, #tpu.memory_space<vmem>>, vector<1x1x96xf32>
    %17 = vector.shape_cast %16 : vector<1x1x96xf32> to vector<1x96xf32>
    %18 = vector.broadcast %17 : vector<1x96xf32> to vector<16x96xf32>
    %19 = arith.addf %15, %18 : vector<16x96xf32>
    %20 = vector.shape_cast %19 : vector<16x96xf32> to vector<2x8x96xf32>
    %21 = vector.extract_strided_slice %20 {offsets = [0, 0, 0], sizes = [2, 8, 32], strides = [1, 1, 1]} : vector<2x8x96xf32> to vector<2x8x32xf32>
    %22 = arith.truncf %21 : vector<2x8x32xf32> to vector<2x8x32xbf16>
    %23 = vector.extract_strided_slice %20 {offsets = [0, 0, 32], sizes = [2, 8, 32], strides = [1, 1, 1]} : vector<2x8x96xf32> to vector<2x8x32xf32>
    %24 = arith.truncf %23 : vector<2x8x32xf32> to vector<2x8x32xbf16>
    %25 = vector.extract_strided_slice %20 {offsets = [0, 0, 64], sizes = [2, 8, 32], strides = [1, 1, 1]} : vector<2x8x96xf32> to vector<2x8x32xf32>
    %26 = arith.truncf %25 : vector<2x8x32xf32> to vector<2x8x32xbf16>
    %27 = vector.extract_strided_slice %22 {offsets = [0, 0, 0], sizes = [2, 8, 16], strides = [1, 1, 1]} : vector<2x8x32xbf16> to vector<2x8x16xbf16>
    %28 = vector.extract_strided_slice %24 {offsets = [0, 0, 0], sizes = [2, 8, 16], strides = [1, 1, 1]} : vector<2x8x32xbf16> to vector<2x8x16xbf16>
    "tpu.trace_start"() <{level = 10 : i32, message = "bqd,bkd->bqk"}> : () -> ()
    %cst_15 = arith.constant dense<0.000000e+00> : vector<2x8x8xf32>
    %29 = tpu.matmul %27, %28, %cst_15 {dimension_numbers = #tpu.dot_dimension_numbers<[2], [2], [1], [1], [0, 0, 0, 1, 1, 1], [0], [0]>} : vector<2x8x16xbf16>, vector<2x8x16xbf16>, vector<2x8x8xf32> -> vector<2x8x8xf32>
    "tpu.trace_stop"() : () -> ()
    %30 = vector.broadcast %4 : vector<2x1x8xf32> to vector<2x8x8xf32>
    %31 = arith.addf %29, %30 : vector<2x8x8xf32>
    %cst_16 = arith.constant dense<0xFF800000> : vector<2x8xf32>
    %32 = vector.multi_reduction <maximumf>, %31, %cst_16 [2] : vector<2x8x8xf32> to vector<2x8xf32>
    %33 = vector.shape_cast %32 : vector<2x8xf32> to vector<2x8x1xf32>
    %34 = vector.broadcast %33 : vector<2x8x1xf32> to vector<2x8x8xf32>
    %35 = arith.subf %31, %34 : vector<2x8x8xf32>
    %36 = math.exp %35 : vector<2x8x8xf32>
    %cst_17 = arith.constant dense<0.000000e+00> : vector<2x8xf32>
    %37 = vector.multi_reduction <add>, %36, %cst_17 [2] : vector<2x8x8xf32> to vector<2x8xf32>
    %38 = vector.shape_cast %37 : vector<2x8xf32> to vector<2x8x1xf32>
    %39 = tpu.reciprocal %38 {approx = true} : vector<2x8x1xf32> -> vector<2x8x1xf32>
    %40 = vector.broadcast %39 : vector<2x8x1xf32> to vector<2x8x8xf32>
    %41 = arith.mulf %36, %40 : vector<2x8x8xf32>
    %42 = arith.truncf %41 : vector<2x8x8xf32> to vector<2x8x8xbf16>
    %43 = vector.extract_strided_slice %26 {offsets = [0, 0, 0], sizes = [2, 8, 16], strides = [1, 1, 1]} : vector<2x8x32xbf16> to vector<2x8x16xbf16>
    "tpu.trace_start"() <{level = 10 : i32, message = "bqk,bkd->bqd"}> : () -> ()
    %cst_18 = arith.constant dense<0.000000e+00> : vector<2x8x16xf32>
    %44 = tpu.matmul %42, %43, %cst_18 {dimension_numbers = #tpu.dot_dimension_numbers<[2], [1], [1], [2], [0, 0, 0, 1, 1, 2], [0], [0]>} : vector<2x8x8xbf16>, vector<2x8x16xbf16>, vector<2x8x16xf32> -> vector<2x8x16xf32>
    "tpu.trace_stop"() : () -> ()
    %c0_19 = arith.constant 0 : index
    %c0_20 = arith.constant 0 : index
    %c0_21 = arith.constant 0 : index
    %45 = vector.load %arg14[%c0_19, %c0_20, %c0_21] : memref<2x8x32xf32, #tpu.memory_space<vmem>>, vector<2x8x16xf32>
    tpu.vector_store %arg14[%c0_19, %c0_20, %c0_21], %44 {strides = array<i32>} : memref<2x8x32xf32, #tpu.memory_space<vmem>>, vector<2x8x16xf32>,
    %46 = vector.extract_strided_slice %22 {offsets = [0, 0, 16], sizes = [2, 8, 16], strides = [1, 1, 1]} : vector<2x8x32xbf16> to vector<2x8x16xbf16>
    %47 = vector.extract_strided_slice %24 {offsets = [0, 0, 16], sizes = [2, 8, 16], strides = [1, 1, 1]} : vector<2x8x32xbf16> to vector<2x8x16xbf16>
    "tpu.trace_start"() <{level = 10 : i32, message = "bqd,bkd->bqk"}> : () -> ()
    %cst_22 = arith.constant dense<0.000000e+00> : vector<2x8x8xf32>
    %48 = tpu.matmul %46, %47, %cst_22 {dimension_numbers = #tpu.dot_dimension_numbers<[2], [2], [1], [1], [0, 0, 0, 1, 1, 1], [0], [0]>} : vector<2x8x16xbf16>, vector<2x8x16xbf16>, vector<2x8x8xf32> -> vector<2x8x8xf32>
    "tpu.trace_stop"() : () -> ()
    %49 = vector.broadcast %4 : vector<2x1x8xf32> to vector<2x8x8xf32>
    %50 = arith.addf %48, %49 : vector<2x8x8xf32>
    %cst_23 = arith.constant dense<0xFF800000> : vector<2x8xf32>
    %51 = vector.multi_reduction <maximumf>, %50, %cst_23 [2] : vector<2x8x8xf32> to vector<2x8xf32>
    %52 = vector.shape_cast %51 : vector<2x8xf32> to vector<2x8x1xf32>
    %53 = vector.broadcast %52 : vector<2x8x1xf32> to vector<2x8x8xf32>
    %54 = arith.subf %50, %53 : vector<2x8x8xf32>
    %55 = math.exp %54 : vector<2x8x8xf32>
    %cst_24 = arith.constant dense<0.000000e+00> : vector<2x8xf32>
    %56 = vector.multi_reduction <add>, %55, %cst_24 [2] : vector<2x8x8xf32> to vector<2x8xf32>
    %57 = vector.shape_cast %56 : vector<2x8xf32> to vector<2x8x1xf32>
    %58 = tpu.reciprocal %57 {approx = true} : vector<2x8x1xf32> -> vector<2x8x1xf32>
    %59 = vector.broadcast %58 : vector<2x8x1xf32> to vector<2x8x8xf32>
    %60 = arith.mulf %55, %59 : vector<2x8x8xf32>
    %61 = arith.truncf %60 : vector<2x8x8xf32> to vector<2x8x8xbf16>
    %62 = vector.extract_strided_slice %26 {offsets = [0, 0, 16], sizes = [2, 8, 16], strides = [1, 1, 1]} : vector<2x8x32xbf16> to vector<2x8x16xbf16>
    "tpu.trace_start"() <{level = 10 : i32, message = "bqk,bkd->bqd"}> : () -> ()
    %cst_25 = arith.constant dense<0.000000e+00> : vector<2x8x16xf32>
    %63 = tpu.matmul %61, %62, %cst_25 {dimension_numbers = #tpu.dot_dimension_numbers<[2], [1], [1], [2], [0, 0, 0, 1, 1, 2], [0], [0]>} : vector<2x8x8xbf16>, vector<2x8x16xbf16>, vector<2x8x16xf32> -> vector<2x8x16xf32>
    "tpu.trace_stop"() : () -> ()
    %c0_26 = arith.constant 0 : index
    %c0_27 = arith.constant 0 : index
    %c16 = arith.constant 16 : index
    %64 = vector.load %arg14[%c0_26, %c0_27, %c16] : memref<2x8x32xf32, #tpu.memory_space<vmem>>, vector<2x8x16xf32>
    tpu.vector_store %arg14[%c0_26, %c0_27, %c16], %63 {strides = array<i32>} : memref<2x8x32xf32, #tpu.memory_space<vmem>>, vector<2x8x16xf32>,
    %c0_28 = arith.constant 0 : index
    %c0_29 = arith.constant 0 : index
    %c0_30 = arith.constant 0 : index
    %65 = vector.load %arg14[%c0_28, %c0_29, %c0_30] : memref<2x8x32xf32, #tpu.memory_space<vmem>>, vector<2x8x32xf32>
    %66 = vector.shape_cast %65 : vector<2x8x32xf32> to vector<16x32xf32>
    %67 = arith.truncf %66 : vector<16x32xf32> to vector<16x32xbf16>
    %c0_31 = arith.constant 0 : index
    %c0_32 = arith.constant 0 : index
    %c0_33 = arith.constant 0 : index
    %68 = vector.load %arg6[%c0_31, %c0_32, %c0_33] : memref<1x32x32xbf16, #tpu.memory_space<vmem>>, vector<1x32x32xbf16>
    %69 = vector.shape_cast %68 : vector<1x32x32xbf16> to vector<32x32xbf16>
    %cst_34 = arith.constant dense<0.000000e+00> : vector<16x32xf32>
    %70 = tpu.matmul %67, %69, %cst_34 {dimension_numbers = #tpu.dot_dimension_numbers<[1], [0], [0], [1], [0, 0, 1, 1], [], []>} : vector<16x32xbf16>, vector<32x32xbf16>, vector<16x32xf32> -> vector<16x32xf32>
    %71 = vector.broadcast %7 : vector<1x32xf32> to vector<16x32xf32>
    %72 = arith.addf %70, %71 : vector<16x32xf32>
    %73 = arith.addf %72, %3 : vector<16x32xf32>
    %cst_35 = arith.constant dense<0.000000e+00> : vector<16xf32>
    %74 = vector.multi_reduction <add>, %73, %cst_35 [1] : vector<16x32xf32> to vector<16xf32>
    %75 = vector.shape_cast %74 : vector<16xf32> to vector<16x1xf32>
    %cst_36 = arith.constant 3.200000e+01 : f32
    %76 = vector.broadcast %cst_36 : f32 to vector<16x1xf32>
    %77 = arith.divf %75, %76 : vector<16x1xf32>
    %78 = vector.broadcast %77 : vector<16x1xf32> to vector<16x32xf32>
    %79 = arith.subf %73, %78 : vector<16x32xf32>
    %80 = arith.mulf %79, %79 : vector<16x32xf32>
    %cst_37 = arith.constant dense<0.000000e+00> : vector<16xf32>
    %81 = vector.multi_reduction <add>, %80, %cst_37 [1] : vector<16x32xf32> to vector<16xf32>
    %82 = vector.shape_cast %81 : vector<16xf32> to vector<16x1xf32>
    %cst_38 = arith.constant 3.200000e+01 : f32
    %83 = vector.broadcast %cst_38 : f32 to vector<16x1xf32>
    %84 = arith.divf %82, %83 : vector<16x1xf32>
    %85 = vector.broadcast %77 : vector<16x1xf32> to vector<16x32xf32>
    %86 = arith.subf %73, %85 : vector<16x32xf32>
    %cst_39 = arith.constant 9.99999974E-6 : f32
    %87 = vector.broadcast %cst_39 : f32 to vector<16x1xf32>
    %88 = arith.addf %84, %87 : vector<16x1xf32>
    %89 = math.rsqrt %88 : vector<16x1xf32>
    %90 = vector.broadcast %89 : vector<16x1xf32> to vector<16x32xf32>
    %91 = arith.mulf %86, %90 : vector<16x32xf32>
    %92 = vector.broadcast %8 : vector<1x32xf32> to vector<16x32xf32>
    %93 = arith.mulf %91, %92 : vector<16x32xf32>
    %94 = vector.broadcast %9 : vector<1x32xf32> to vector<16x32xf32>
    %95 = arith.addf %93, %94 : vector<16x32xf32>
    %96 = arith.truncf %95 : vector<16x32xf32> to vector<16x32xbf16>
    %c0_40 = arith.constant 0 : index
    %c0_41 = arith.constant 0 : index
    %c0_42 = arith.constant 0 : index
    %97 = vector.load %arg7[%c0_40, %c0_41, %c0_42] : memref<1x32x128xbf16, #tpu.memory_space<vmem>>, vector<1x32x128xbf16>
    %98 = vector.shape_cast %97 : vector<1x32x128xbf16> to vector<32x128xbf16>
    %cst_43 = arith.constant dense<0.000000e+00> : vector<16x128xf32>
    %99 = tpu.matmul %96, %98, %cst_43 {dimension_numbers = #tpu.dot_dimension_numbers<[1], [0], [0], [1], [0, 0, 1, 1], [], []>} : vector<16x32xbf16>, vector<32x128xbf16>, vector<16x128xf32> -> vector<16x128xf32>
    %c0_44 = arith.constant 0 : index
    %c0_45 = arith.constant 0 : index
    %c0_46 = arith.constant 0 : index
    %100 = vector.load %arg10[%c0_44, %c0_45, %c0_46] : memref<1x1x128xf32, #tpu.memory_space<vmem>>, vector<1x1x128xf32>
    %101 = vector.shape_cast %100 : vector<1x1x128xf32> to vector<1x128xf32>
    %102 = vector.broadcast %101 : vector<1x128xf32> to vector<16x128xf32>
    %103 = arith.addf %99, %102 : vector<16x128xf32>
    %cst_47 = arith.constant 5.000000e-01 : f32
    %104 = vector.broadcast %cst_47 : f32 to vector<16x128xf32>
    %105 = arith.mulf %104, %103 : vector<16x128xf32>
    %cst_48 = arith.constant 4.471500e-02 : f32
    %106 = vector.broadcast %cst_48 : f32 to vector<16x128xf32>
    %107 = arith.mulf %106, %103 : vector<16x128xf32>
    %108 = arith.mulf %107, %103 : vector<16x128xf32>
    %109 = arith.mulf %108, %103 : vector<16x128xf32>
    %110 = arith.addf %103, %109 : vector<16x128xf32>
    %cst_49 = arith.constant 0.797884583 : f32
    %111 = vector.broadcast %cst_49 : f32 to vector<16x128xf32>
    %112 = arith.mulf %111, %110 : vector<16x128xf32>
    %113 = math.tanh %112 : vector<16x128xf32>
    %cst_50 = arith.constant 1.000000e+00 : f32
    %114 = vector.broadcast %cst_50 : f32 to vector<16x128xf32>
    %115 = arith.addf %114, %113 : vector<16x128xf32>
    %116 = arith.mulf %105, %115 : vector<16x128xf32>
    %117 = arith.truncf %116 : vector<16x128xf32> to vector<16x128xbf16>
    %c0_51 = arith.constant 0 : index
    %c0_52 = arith.constant 0 : index
    %c0_53 = arith.constant 0 : index
    %118 = vector.load %arg8[%c0_51, %c0_52, %c0_53] : memref<1x128x32xbf16, #tpu.memory_space<vmem>>, vector<1x128x32xbf16>
    %119 = vector.shape_cast %118 : vector<1x128x32xbf16> to vector<128x32xbf16>
    %cst_54 = arith.constant dense<0.000000e+00> : vector<16x32xf32>
    %120 = tpu.matmul %117, %119, %cst_54 {dimension_numbers = #tpu.dot_dimension_numbers<[1], [0], [0], [1], [0, 0, 1, 1], [], []>} : vector<16x128xbf16>, vector<128x32xbf16>, vector<16x32xf32> -> vector<16x32xf32>
    %121 = vector.broadcast %10 : vector<1x32xf32> to vector<16x32xf32>
    %122 = arith.addf %120, %121 : vector<16x32xf32>
    %123 = arith.addf %122, %95 : vector<16x32xf32>
    %cst_55 = arith.constant dense<0.000000e+00> : vector<16xf32>
    %124 = vector.multi_reduction <add>, %123, %cst_55 [1] : vector<16x32xf32> to vector<16xf32>
    %125 = vector.shape_cast %124 : vector<16xf32> to vector<16x1xf32>
    %cst_56 = arith.constant 3.200000e+01 : f32
    %126 = vector.broadcast %cst_56 : f32 to vector<16x1xf32>
    %127 = arith.divf %125, %126 : vector<16x1xf32>
    %128 = vector.broadcast %127 : vector<16x1xf32> to vector<16x32xf32>
    %129 = arith.subf %123, %128 : vector<16x32xf32>
    %130 = arith.mulf %129, %129 : vector<16x32xf32>
    %cst_57 = arith.constant dense<0.000000e+00> : vector<16xf32>
    %131 = vector.multi_reduction <add>, %130, %cst_57 [1] : vector<16x32xf32> to vector<16xf32>
    %132 = vector.shape_cast %131 : vector<16xf32> to vector<16x1xf32>
    %cst_58 = arith.constant 3.200000e+01 : f32
    %133 = vector.broadcast %cst_58 : f32 to vector<16x1xf32>
    %134 = arith.divf %132, %133 : vector<16x1xf32>
    %135 = vector.broadcast %127 : vector<16x1xf32> to vector<16x32xf32>
    %136 = arith.subf %123, %135 : vector<16x32xf32>
    %cst_59 = arith.constant 9.99999974E-6 : f32
    %137 = vector.broadcast %cst_59 : f32 to vector<16x1xf32>
    %138 = arith.addf %134, %137 : vector<16x1xf32>
    %139 = math.rsqrt %138 : vector<16x1xf32>
    %140 = vector.broadcast %139 : vector<16x1xf32> to vector<16x32xf32>
    %141 = arith.mulf %136, %140 : vector<16x32xf32>
    %142 = vector.broadcast %11 : vector<1x32xf32> to vector<16x32xf32>
    %143 = arith.mulf %141, %142 : vector<16x32xf32>
    %144 = vector.broadcast %12 : vector<1x32xf32> to vector<16x32xf32>
    %145 = arith.addf %143, %144 : vector<16x32xf32>
    %146 = arith.truncf %145 : vector<16x32xf32> to vector<16x32xbf16>
    %c0_60 = arith.constant 0 : index
    %c0_61 = arith.constant 0 : index
    %147 = vector.load %arg11[%c0_60, %c0_61] : memref<32x128xbf16, #tpu.memory_space<vmem>>, vector<32x128xbf16>
    %cst_62 = arith.constant dense<0.000000e+00> : vector<16x128xf32>
    %148 = tpu.matmul %146, %147, %cst_62 {dimension_numbers = #tpu.dot_dimension_numbers<[1], [0], [0], [1], [0, 0, 1, 1], [], []>} : vector<16x32xbf16>, vector<32x128xbf16>, vector<16x128xf32> -> vector<16x128xf32>
    %c0_63 = arith.constant 0 : index
    %c0_64 = arith.constant 0 : index
    %149 = vector.load %arg12[%c0_63, %c0_64] : memref<1x128xf32, #tpu.memory_space<vmem>>, vector<1x128xf32>
    %150 = vector.broadcast %149 : vector<1x128xf32> to vector<16x128xf32>
    %151 = arith.addf %148, %150 : vector<16x128xf32>
    %152 = vector.shape_cast %151 : vector<16x128xf32> to vector<2x8x128xf32>
    %c0_i32 = arith.constant 0 : i32
    %153 = arith.cmpi eq, %arg1, %c0_i32 : i32
    %154 = arith.extui %153 : i1 to i32
    %c0_i32_65 = arith.constant 0 : i32
    %155 = arith.cmpi ne, %154, %c0_i32_65 : i32
    scf.if %155 {
      %cst_73 = arith.constant 0.000000e+00 : f32
      %162 = vector.broadcast %cst_73 : f32 to vector<2x8x128xf32>
      %c0_74 = arith.constant 0 : index
      %c0_75 = arith.constant 0 : index
      %c0_76 = arith.constant 0 : index
      %163 = vector.load %arg13[%c0_74, %c0_75, %c0_76] : memref<2x8x128xf32, #tpu.memory_space<vmem>>, vector<2x8x128xf32>
      tpu.vector_store %arg13[%c0_74, %c0_75, %c0_76], %162 {strides = array<i32>} : memref<2x8x128xf32, #tpu.memory_space<vmem>>, vector<2x8x128xf32>,
    } else {
    }
    %c0_66 = arith.constant 0 : index
    %c0_67 = arith.constant 0 : index
    %c0_68 = arith.constant 0 : index
    %156 = vector.load %arg13[%c0_66, %c0_67, %c0_68] : memref<2x8x128xf32, #tpu.memory_space<vmem>>, vector<2x8x128xf32>
    %157 = arith.addf %156, %152 : vector<2x8x128xf32>
    %c0_69 = arith.constant 0 : index
    %c0_70 = arith.constant 0 : index
    %c0_71 = arith.constant 0 : index
    %158 = vector.load %arg13[%c0_69, %c0_70, %c0_71] : memref<2x8x128xf32, #tpu.memory_space<vmem>>, vector<2x8x128xf32>
    tpu.vector_store %arg13[%c0_69, %c0_70, %c0_71], %157 {strides = array<i32>} : memref<2x8x128xf32, #tpu.memory_space<vmem>>, vector<2x8x128xf32>,
    %c1_i32 = arith.constant 1 : i32
    %159 = arith.cmpi eq, %arg1, %c1_i32 : i32
    %160 = arith.extui %159 : i1 to i32
    %c0_i32_72 = arith.constant 0 : i32
    %161 = arith.cmpi ne, %160, %c0_i32_72 : i32
    scf.if %161 {
      %c0_73 = arith.constant 0 : index
      %c0_74 = arith.constant 0 : index
      %c0_75 = arith.constant 0 : index
      %162 = vector.load %arg13[%c0_73, %c0_74, %c0_75] : memref<2x8x128xf32, #tpu.memory_space<vmem>>, vector<2x8x128xf32>
      %cst_76 = arith.constant 5.000000e-01 : f32
      %163 = vector.broadcast %cst_76 : f32 to vector<2x8x128xf32>
      %164 = arith.mulf %162, %163 : vector<2x8x128xf32>
      %c0_77 = arith.constant 0 : index
      %c0_78 = arith.constant 0 : index
      %c0_79 = arith.constant 0 : index
      %165 = vector.load %arg13[%c0_77, %c0_78, %c0_79] : memref<2x8x128xf32, #tpu.memory_space<vmem>>, vector<2x8x128xf32>
      tpu.vector_store %arg13[%c0_77, %c0_78, %c0_79], %164 {strides = array<i32>} : memref<2x8x128xf32, #tpu.memory_space<vmem>>, vector<2x8x128xf32>,
    } else {
    }
    return
  }
  func.func @transform_0(%arg0: i32, %arg1: i32) -> (i32, i32, i32, i32) {
    %c0_i32 = arith.constant 0 : i32
    %c0_i32_0 = arith.constant 0 : i32
    %c0_i32_1 = arith.constant 0 : i32
    return %arg1, %arg0, %c0_i32, %c0_i32_0 : i32, i32, i32, i32
  }
  func.func @transform_1(%arg0: i32, %arg1: i32) -> (i32, i32, i32) {
    %c0_i32 = arith.constant 0 : i32
    %c0_i32_0 = arith.constant 0 : i32
    %c0_i32_1 = arith.constant 0 : i32
    return %arg0, %c0_i32, %c0_i32_0 : i32, i32, i32
  }
  func.func @transform_2(%arg0: i32, %arg1: i32) -> (i32, i32, i32) {
    %c0_i32 = arith.constant 0 : i32
    %c0_i32_0 = arith.constant 0 : i32
    %c0_i32_1 = arith.constant 0 : i32
    return %arg1, %c0_i32, %c0_i32_0 : i32, i32, i32
  }
  func.func @transform_3(%arg0: i32, %arg1: i32) -> (i32, i32, i32) {
    %c0_i32 = arith.constant 0 : i32
    %c0_i32_0 = arith.constant 0 : i32
    %c0_i32_1 = arith.constant 0 : i32
    return %arg1, %c0_i32, %c0_i32_0 : i32, i32, i32
  }
  func.func @transform_4(%arg0: i32, %arg1: i32) -> (i32, i32, i32) {
    %c0_i32 = arith.constant 0 : i32
    %c0_i32_0 = arith.constant 0 : i32
    %c0_i32_1 = arith.constant 0 : i32
    return %arg1, %c0_i32, %c0_i32_0 : i32, i32, i32
  }
  func.func @transform_5(%arg0: i32, %arg1: i32) -> (i32, i32, i32) {
    %c0_i32 = arith.constant 0 : i32
    %c0_i32_0 = arith.constant 0 : i32
    %c0_i32_1 = arith.constant 0 : i32
    return %arg1, %c0_i32, %c0_i32_0 : i32, i32, i32
  }
  func.func @transform_6(%arg0: i32, %arg1: i32) -> (i32, i32, i32) {
    %c0_i32 = arith.constant 0 : i32
    %c0_i32_0 = arith.constant 0 : i32
    %c0_i32_1 = arith.constant 0 : i32
    return %arg1, %c0_i32, %c0_i32_0 : i32, i32, i32
  }
  func.func @transform_7(%arg0: i32, %arg1: i32) -> (i32, i32, i32) {
    %c0_i32 = arith.constant 0 : i32
    %c0_i32_0 = arith.constant 0 : i32
    %c0_i32_1 = arith.constant 0 : i32
    return %arg1, %c0_i32, %c0_i32_0 : i32, i32, i32
  }
  func.func @transform_8(%arg0: i32, %arg1: i32) -> (i32, i32, i32) {
    %c0_i32 = arith.constant 0 : i32
    %c0_i32_0 = arith.constant 0 : i32
    %c0_i32_1 = arith.constant 0 : i32
    return %arg1, %c0_i32, %c0_i32_0 : i32, i32, i32
  }
  func.func @transform_9(%arg0: i32, %arg1: i32) -> (i32, i32) {
    %c0_i32 = arith.constant 0 : i32
    %c0_i32_0 = arith.constant 0 : i32
    %c0_i32_1 = arith.constant 0 : i32
    return %c0_i32, %c0_i32_0 : i32, i32
  }
  func.func @transform_10(%arg0: i32, %arg1: i32) -> (i32, i32) {
    %c0_i32 = arith.constant 0 : i32
    %c0_i32_0 = arith.constant 0 : i32
    %c0_i32_1 = arith.constant 0 : i32
    return %c0_i32, %c0_i32_0 : i32, i32
  }
  func.func @transform_11(%arg0: i32, %arg1: i32) -> (i32, i32, i32) {
    %c0_i32 = arith.constant 0 : i32
    %c0_i32_0 = arith.constant 0 : i32
    %c0_i32_1 = arith.constant 0 : i32
    return %arg0, %c0_i32, %c0_i32_0 : i32, i32, i32
  }
}

</mosaic_0001>

<bundles_post_ra>
// kernel: tpu_custom_call.1
= control target key start
LH: loop header
LB: loop body
LE: loop exit
PB: predicated region body
PF: predicated region fallthrough
CT: control target
= control target key end

     0   :  { %16 = vsyncpa [#allocation4], 0  ;;  %s1683_s17 = smov 0   ;;  %s1685_s18 = smov 0   ;;  %s1849_s0 = inlined_call_operand.vmem [shape: bf16[2,2,8,32], index: 0, kind: input, shape index: {}]   ;;  %s1850_s1 = inlined_call_operand.vmem [shape: f32[2,1,8], index: 1, kind: input, shape index: {}]   ;;  %s1851_s2 = inlined_call_operand.vmem [shape: bf16[2,32,96], index: 2, kind: input, shape index: {}]   ;;  %s1852_s3 = inlined_call_operand.vmem [shape: f32[2,1,96], index: 3, kind: input, shape index: {}]   ;;  %s1853_s4 = inlined_call_operand.vmem [shape: bf16[2,32,32], index: 4, kind: input, shape index: {}]   ;;  %s1854_s5 = inlined_call_operand.vmem [shape: bf16[2,32,128], index: 5, kind: input, shape index: {}]   ;;  %s1855_s6 = inlined_call_operand.vmem [shape: bf16[2,128,32], index: 6, kind: input, shape index: {}]   ;;  %s1856_s7 = inlined_call_operand.vmem [shape: f32[2,6,32], index: 7, kind: input, shape index: {}]   ;;  %s1857_s8 = inlined_call_operand.vmem [shape: f32[2,1,128], index: 8, kind: input, shape index: {}]   ;;  %s1858_s9 = inlined_call_operand.vmem [shape: bf16[32,128], index: 9, kind: input, shape index: {}]   ;;  %s1859_s10 = inlined_call_operand.vmem [shape: f32[1,128], index: 10, kind: input, shape index: {}]   ;;  %s1860_s11 = inlined_call_operand.hbm [shape: f32[2,8,128], index: 11, kind: output, shape index: {}]  }
   0x1   :  { %s1687_s19 = smov 0  }
   0x2 LB: > { %s1356_s20 = sadd.s32 4294967295, %s1610_s19   ;;  %s31_s21 = sadd.s32 1, %s1606_s18  ;;  %s1610_s19 = sphi %s1687_s19, %s22_s19   ;;  %s1606_s18 = sphi %s1685_s18, %s1862_s18   ;;  %s1602_s17 = sphi %s1683_s17, %s1861_s17  }
   0x3   : > { %p32_p0 = scmp.ge.s32.totalorder %s31_s21, 2  ;;  %p1360_p1 = scmp.ge.s32.totalorder %s1610_s19, 1 }
   0x4   : > { %p432_p2 = scmp.lt.s32.totalorder %s1610_s19, 3 }
   0x5   : > { %s1864_s21 = smov (%p32_p0, %s31_s21), 0 }
   0x6   : > { %p433_p3 = pnand %p1360_p1, %p432_p2 }
   0x7   : > { %p506_p4 = scmp.lt.s32.totalorder (!%p433_p3), %s1602_s17, 1  ;;  %s1612_s15 = smov (!%p433_p3), 112  }
   0x8   : > { %436 = sbr.rel (%p433_p3) target bundleno = 2107 (0x83b), region = 64  ;;  %s1613_s16 = smov (!%p433_p3), 80  }
   0x9   : > { %s1614_s24 = smov (!%p433_p3), 96   ;;  %s1616_s12 = smov (!%p433_p3), 48  }
   0xa   : > { %s1617_s13 = smov (!%p433_p3), 16   ;;  %p1452_p5 = scmp.ne.s32.totalorder (!%p433_p3), %s1602_s17, 0 }
   0xd   : > { %s1706_s22 = scalar_select %p506_p4, %s1602_s17, 1  ;;  %vm584_vm0 = vcmask 261120   ;;  %vm615_vm1 = vcmask 130048   ;;  %v1522_v24 = vld [vmem:[%s1850_s1] ss:$0 sm:$0xff]  ;;  %vm659_vm2 = vcmask 64512  }
   0xe   : > { %v1523_v33 = vld [vmem:[%s1850_s1 + $0x1] ss:$0 sm:$0xff]  ;;  %vm689_vm3 = vcmask 1043456   ;;  %vm849_vm4 = vcmask 261248  }
   0xf   : > { %s1709_s23 = sshll.u32 %s1706_s22, 4  ;;  %s1458_s27 = sshll.u32 %s1706_s22, 3 }
  0x10   : > { %s524_s26 = scalar_lea.vmem %s1851_s2, %s1709_s23  ;;  %s527_s30 = scalar_lea.vmem %s1852_s3, %s1706_s22 }
  0x11   : > { %v1465_v0 = vld [vmem:[%s524_s26 + $0x8] sm:$0xff]  ;;  %v1464_v1 = vld [vmem:[%s524_s26] sm:$0xff]  ;;  %s1725_s14 = scalar_lea.vmem %s1849_s0, %s1458_s27  ;;  %s546_s28 = scalar_lea.vmem %s1856_s7, %s1458_s27 }
  0x12   : > { %594 = vmatpush.bf16.msra.mxu0 %v1465_v0  ;;  %v1463_v2 = vld [vmem:[%s1725_s14] sm:$0xff]  ;;  %s549_s29 = scalar_lea.vmem %s1857_s8, %s1706_s22 }
  0x13   : > { %v1521_v3 = vld [vmem:[%s527_s30] ss:$0 sm:$0xff]  ;;  %s1615_s30 = smov 64  }
  0x16   : > { %595 = vmatpush.bf16.msra.mxu0 %v1464_v1 }
  0x19   : > { %1384 = vmatmul.msk.bf16.vlgmr.msra.gmra.mxu0 %vm584_vm0, %v1463_v2 }
  0x96   : > { %v597_v4 = vpop.f32.mrf.mxu0 }
  0x97   : > { %v598_v5 = vadd.f32 %v1521_v3, %v597_v4 }
  0x99   : > { %v602_v6 = vpack.c.bf16 %v598_v5, %v598_v5 }
  0x9b   : > { %v611_v7 = vunpack.c.l.b16 %v602_v6 }
  0x9d   : > { %v612_v8 = vpack.c.b16 %v611_v7, %v611_v7 }
  0x9e   : > { %v599_v9 = vpop.f32.mrf.mxu0 }
  0x9f   : > { %v600_v10 = vadd.f32 %v1521_v3, %v599_v9  ;;  %729 = vrot.lane.b32.xlu2 %v612_v8, %s1612_s15  ;;  %731 = vrot.lane.b32.xlu1 %v612_v8, %s1613_s16 }
  0xa0   : > { %613 = vrot.lane.b32.xlu0 %v612_v8, %s1614_s24 }
  0xa1   : > { %v603_v11 = vpack.c.bf16 %v600_v10, %v600_v10 }
  0xa3   : > { %v636_v12 = vunpack.c.l.b16 %v603_v11 }
  0xa5   : > { %v1729_v13 = vpack.c.b16 %v636_v12, %v636_v12 }
  0xa7   : > { %752 = vrot.lane.b32.xlu2 %v1729_v13, %s1612_s15  ;;  %754 = vrot.lane.b32.xlu1 %v1729_v13, %s1613_s16 }
  0xa8   : > { %638 = vrot.lane.b32.xlu0 %v1729_v13, %s1614_s24  ;;  %s532_s24 = scalar_lea.vmem %s1853_s4, %s1709_s23 }
  0xf9   : > { %v730_v18 = vpop.permute.xlu2 %729 }
 0x101   : > { %v753_v23 = vpop.permute.xlu2 %752 }
 0x111   : > { %v732_v14 = vpop.permute.xlu1 %731 }
 0x112   : > { %v614_v15 = vpop.permute.xlu0 %613  ;;  %v737_v16 = vsel %vm615_vm1, %v732_v14, 0 }
 0x113   : > { %v620_v17 = vsel %vm615_vm1, %v614_v15, 0  ;;  %746 = vmatpush.bf16.xpose.msrb.mxu0 %v737_v16 }
 0x114   : > { %629 = vmatpush.bf16.xpose.msra.mxu1 %v620_v17 }
 0x119   : > { %v755_v19 = vpop.permute.xlu1 %754 }
 0x11a   : > { %v639_v20 = vpop.permute.xlu0 %638  ;;  %1389 = vmatmul.msk.bf16.vlgmr.msrb.gmra.mxu0 %vm615_vm1, %v730_v18  ;;  %v760_v21 = vsel %vm615_vm1, %v755_v19, 0 }
 0x11b   : > { %1385 = vmatmul.msk.bf16.vlgmr.msra.gmra.mxu1 %vm615_vm1, %v602_v6  ;;  %v644_v22 = vsel %vm615_vm1, %v639_v20, 0 }
 0x11c   : > { %653 = vmatpush.bf16.xpose.msra.mxu2 %v644_v22  ;;  %769 = vmatpush.bf16.xpose.msrb.mxu1 %v760_v21 }
 0x123   : > { %1386 = vmatmul.msk.bf16.vlgmr.msra.gmra.mxu2 %vm615_vm1, %v603_v11 }
 0x12b   : > { %1390 = vmatmul.msk.bf16.vlgmr.msrb.gmra.mxu1 %vm615_vm1, %v753_v23 }
 0x197   : > { %v748_v25 = vpop.f32.mrf.mxu0 }
 0x198   : > { %v631_v26 = vpop.f32.mrf.mxu1  ;;  %v749_v27 = vadd.f32 %v1522_v24, %v748_v25 }
 0x199   : > { %v632_v28 = vadd.f32 %v1522_v24, %v631_v26 }
 0x19a   : > { %v775_v29 = vsel %vm659_vm2, %v749_v27, -inf }
 0x19b   : > { %776 = vmax.xlane.f32.xlu2 %v775_v29  ;;  %v660_v30 = vsel %vm659_vm2, %v632_v28, -inf }
 0x19c   : > { %661 = vmax.xlane.f32.xlu0 %v660_v30  ;;  %v1467_v30 = vld [vmem:[%s532_s24 + $0x8] sm:$0xff] }
 0x19d   : > { %881 = vmatpush.bf16.msra.mxu0 %v1467_v30 }
 0x19f   : > { %v750_v31 = vpop.f32.mrf.mxu0 }
 0x1a0   : > { %v633_v32 = vpop.f32.mrf.mxu1 }
 0x1a1   : > { %v1466_v32 = vld [vmem:[%s532_s24] sm:$0xff] }
 0x1a2   : > { %882 = vmatpush.bf16.msra.mxu0 %v1466_v32 }
 0x1a6   : > { %v655_v34 = vpop.f32.mrf.mxu2 }
 0x1a7   : > { %v656_v35 = vadd.f32 %v1523_v33, %v655_v34 }
 0x1a8   : > { %v771_v36 = vpop.f32.mrf.mxu1 }
 0x1a9   : > { %v772_v37 = vadd.f32 %v1523_v33, %v771_v36  ;;  %v663_v38 = vsel %vm659_vm2, %v656_v35, -inf }
 0x1aa   : > { %664 = vmax.xlane.f32.xlu1 %v663_v38  ;;  %v552_v38 = vld [vmem:[%s1725_s14] sm:$0xff]  }
 0x1ab   : > { %v778_v39 = vsel %vm659_vm2, %v772_v37, -inf }
 0x1ac   : > { %779 = vmax.xlane.f32.xlu2 %v778_v39 }
 0x1ae   : > { %v657_v40 = vpop.f32.mrf.mxu2 }
 0x1af   : > { %v554_v40 = vunpack.c.l.bf16 %v552_v38 }
 0x1b0   : > { %v773_v41 = vpop.f32.mrf.mxu1  ;;  %706 = vrot.lane.b32.xlu0 %v1729_v13, %s1615_s30 }
 0x1c3   : > { %684 = vrot.lane.b32.xlu1 %v612_v8, %s1615_s30 }
 0x1cb   : > { %799 = vrot.lane.b32.xlu1 %v612_v8, %s1616_s12 }
 0x20e   : > { %v777_v47 = vpop.xlane.xlu2 %776 }
 0x20f   : > { %v662_v42 = vpop.xlane.xlu0 %661  ;;  %v781_v50 = vsub.f32 %v749_v27, %v777_v47 }
 0x210   : > { %v666_v43 = vsub.f32 %v632_v28, %v662_v42 }
 0x211   : > { %v783_v52 = vmul.f32 1.442695, %v781_v50  ;;  %v1618_v50 = vmov 32.0  }
 0x212   : > { %v668_v44 = vmul.f32 1.442695, %v666_v43 }
 0x214   : > { %1526 = vpow2.f32 %v668_v44 }
 0x21a   : > { %v1527_v45 = vpop.eup %1526 }
 0x21b   : > { %v672_v46 = vsel %vm659_vm2, %v1527_v45, 0.0 }
 0x21c   : > { %673 = vadd.xlane.f32.xlu0 %v672_v46 }
 0x21d   : > { %v665_v48 = vpop.xlane.xlu1 %664 }
 0x21e   : > { %v667_v49 = vsub.f32 %v656_v35, %v665_v48 }
 0x21f   : > { %v780_v53 = vpop.xlane.xlu2 %779 }
 0x220   : > { %v670_v51 = vmul.f32 1.442695, %v667_v49  ;;  %v782_v55 = vsub.f32 %v772_v37, %v780_v53  ;;  %v1778_v37 = vld [vmem:[%s546_s28] sm:$0x3f] }
 0x221   : > { %v859_v39 = vperm.slane %v1778_v37, 0 }
 0x222   : > { %1528 = vpow2.f32 %v670_v51  ;;  %v785_v57 = vmul.f32 1.442695, %v782_v55  ;;  %v707_v60 = vpop.permute.xlu0 %706 }
 0x223   : > { %1530 = vpow2.f32 %v783_v52  ;;  %v712_v0 = vsel %vm689_vm3, %v707_v60, 0 }
 0x224   : > { %1532 = vpow2.f32 %v785_v57 }
 0x228   : > { %v1529_v54 = vpop.eup %1528 }
 0x229   : > { %v675_v56 = vsel %vm659_vm2, %v1529_v54, 0.0  ;;  %v1531_v58 = vpop.eup %1530 }
 0x22a   : > { %676 = vadd.xlane.f32.xlu2 %v675_v56  ;;  %v787_v59 = vsel %vm659_vm2, %v1531_v58, 0.0  ;;  %v1533_v62 = vpop.eup %1532 }
 0x22b   : > { %v790_v1 = vsel %vm659_vm2, %v1533_v62, 0.0 }
 0x230   : > { %820 = vrot.lane.b32.xlu0 %v1729_v13, %s1616_s12 }
 0x232   : > { %788 = vadd.xlane.f32.xlu2 %v787_v59 }
 0x235   : > { %v685_v61 = vpop.permute.xlu1 %684 }
 0x236   : > { %v691_v63 = vsel %vm689_vm3, %v685_v61, 0 }
 0x237   : > { %700 = vmatpush.bf16.msra.mxu3 %v691_v63 }
 0x23a   : > { %791 = vadd.xlane.f32.xlu2 %v790_v1 }
 0x23b   : > { %721 = vmatpush.bf16.msrb.mxu3 %v712_v0 }
 0x23d   : > { %v800_v2 = vpop.permute.xlu1 %799 }
 0x23e   : > { %v805_v3 = vsel %vm689_vm3, %v800_v2, 0 }
 0x23f   : > { %814 = vmatpush.bf16.msrb.mxu2 %v805_v3 }
 0x28f   : > { %v674_v4 = vpop.xlane.xlu0 %673 }
 0x290   : > { %1534 = vrcp.f32 %v674_v4 }
 0x296   : > { %v1535_v5 = vpop.eup %1534 }
 0x297   : > { %v680_v6 = vmul.f32 %v1535_v5, %v1527_v45  ;;  %v555_v45 = vunpack.c.h.bf16 %v552_v38 }
 0x299   : > { %v682_v7 = vpack.c.bf16 %v680_v6, %v680_v6 }
 0x29b   : > { %1387 = vmatmul.msk.bf16.vlgmr.msra.gmra.mxu3 %vm659_vm2, %v682_v7 }
 0x29d   : > { %v677_v8 = vpop.xlane.xlu2 %676 }
 0x29e   : > { %1536 = vrcp.f32 %v677_v8 }
 0x2a2   : > { %v821_v9 = vpop.permute.xlu0 %820 }
 0x2a3   : > { %v826_v10 = vsel %vm689_vm3, %v821_v9, 0 }
 0x2a4   : > { %v1537_v11 = vpop.eup %1536  ;;  %835 = vmatpush.bf16.msra.mxu3 %v826_v10 }
 0x2a5   : > { %v681_v12 = vmul.f32 %v1537_v11, %v1529_v54  ;;  %v789_v13 = vpop.xlane.xlu2 %788 }
 0x2a6   : > { %1538 = vrcp.f32 %v789_v13 }
 0x2a7   : > { %v683_v14 = vpack.c.bf16 %v681_v12, %v681_v12 }
 0x2ab   : > { %1388 = vmatmul.msk.bf16.vlgmr.msrb.gmra.mxu3 %vm659_vm2, %v683_v14 }
 0x2ac   : > { %v1539_v15 = vpop.eup %1538 }
 0x2ad   : > { %v795_v16 = vmul.f32 %v1539_v15, %v1531_v58  ;;  %v792_v17 = vpop.xlane.xlu2 %791 }
 0x2ae   : > { %1540 = vrcp.f32 %v792_v17 }
 0x2af   : > { %v797_v18 = vpack.c.bf16 %v795_v16, %v795_v16  ;;  %1542 = vrcp.f32 %v1618_v50 }
 0x2b1   : > { %1391 = vmatmul.msk.bf16.vlgmr.msrb.gmra.mxu2 %vm659_vm2, %v797_v18 }
 0x2b4   : > { %v1541_v19 = vpop.eup %1540 }
 0x2b5   : > { %v796_v20 = vmul.f32 %v1541_v19, %v1533_v62  ;;  %v1543_v51 = vpop.eup %1542 }
 0x2b6   : > { %v898_v52 = vmul.f32 32.0, %v1543_v51  ;;  %vm902_vm5 = vweird.f32 %v1543_v51 }
 0x2b7   : > { %v798_v21 = vpack.c.bf16 %v796_v20, %v796_v20 }
 0x2b8   : > { %v899_v53 = vsub.f32 1.0, %v898_v52 }
 0x2ba   : > { %v900_v54 = vmul.f32 %v1543_v51, %v899_v53 }
 0x2bb   : > { %1392 = vmatmul.msk.bf16.vlgmr.msra.gmra.mxu3 %vm659_vm2, %v798_v21 }
 0x2bc   : > { %v901_v55 = vadd.f32 %v1543_v51, %v900_v54 }
 0x2be   : > { %v1784_v56 = vsel %vm902_vm5, %v1543_v51, %v901_v55 }
 0x31e   : > { %v702_v22 = vpop.f32.mrf.mxu3 }
 0x31f   : > { %727 = vst.msk [vmem:[#allocation2] sm:$0xff] %vm615_vm1, %v702_v22 }
 0x326   : > { %v704_v23 = vpop.f32.mrf.mxu3 }
 0x327   : > { %v942_v23 = vperm.slane %v1778_v37, 1 }
 0x32e   : > { %v723_v24 = vpop.f32.mrf.mxu3 }
 0x32f   : > { %728 = vst.msk [vmem:[#allocation2 + $0x8] sm:$0xff] %vm615_vm1, %v723_v24 }
 0x334   : > { %v816_v25 = vpop.f32.mrf.mxu2 }
 0x335   : > { %843 = vrot.lane.b32.xlu2 %v816_v25, %s1617_s13 }
 0x336   : > { %v725_v26 = vpop.f32.mrf.mxu3 }
 0x33c   : > { %v818_v27 = vpop.f32.mrf.mxu2 }
 0x33d   : > { %v945_v27 = vperm.slane %v1778_v37, 2 }
 0x33e   : > { %v837_v28 = vpop.f32.mrf.mxu3 }
 0x33f   : > { %845 = vrot.lane.b32.xlu1 %v837_v28, %s1617_s13  ;;  %s537_s13 = scalar_lea.vmem %s1854_s5, %s1709_s23  ;;  %s1462_s23 = sshll.u32 %s1706_s22, 6 }
 0x340   : > { %v1469_v3 = vld [vmem:[%s537_s13 + $0x8] sm:$0xff]  ;;  %v1468_v6 = vld [vmem:[%s537_s13] sm:$0xff]  ;;  %s542_s24 = scalar_lea.vmem %s1855_s6, %s1462_s23 }
 0x341   : > { %978 = vmatpush.bf16.msra.mxu1 %v1469_v3  ;;  %v1474_v38 = vld [vmem:[%s542_s24 + $0x20] sm:$0xff] }
 0x345   : > { %979 = vmatpush.bf16.msra.mxu1 %v1468_v6 }
 0x346   : > { %v839_v29 = vpop.f32.mrf.mxu3 }
 0x38f   : > { %v844_v31 = vpop.permute.xlu2 %843 }
 0x390   : > { %850 = vst.msk [vmem:[#allocation2] sm:$0xff] %vm849_vm4, %v844_v31 }
 0x397   : > { %v852_v34 = vld [vmem:[#allocation2] sm:$0xff] }
 0x3b1   : > { %v846_v33 = vpop.permute.xlu1 %845 }
 0x3b2   : > { %851 = vst.msk [vmem:[#allocation2 + $0x8] sm:$0xff] %vm849_vm4, %v846_v33 }
 0x3b9   : > { %v853_v35 = vld [vmem:[#allocation2 + $0x8] sm:$0xff] }
 0x3ba   : > { %v854_v36 = vpack.c.bf16 %v853_v35, %v852_v34  ;;  %v1477_v34 = vld [vmem:[%s542_s24 + $0x38] sm:$0xff]  ;;  %v1476_v35 = vld [vmem:[%s542_s24 + $0x30] sm:$0xff] }
 0x3bb   : > { %1070 = vmatpush.bf16.msra.mxu2 %v1477_v34 }
 0x3bc   : > { %1401 = vmatmul.msk.bf16.vlgmr.msra.gmra.mxu0 %vm584_vm0, %v854_v36  ;;  %v1475_v36 = vld [vmem:[%s542_s24 + $0x28] sm:$0xff] }
 0x3bf   : > { %1071 = vmatpush.bf16.msra.mxu2 %v1476_v35 }
 0x3c3   : > { %1072 = vmatpush.bf16.msra.mxu2 %v1475_v36 }
 0x3c7   : > { %1073 = vmatpush.bf16.msra.mxu2 %v1474_v38 }
 0x439   : > { %v884_v41 = vpop.f32.mrf.mxu0 }
 0x43a   : > { %v885_v42 = vadd.f32 %v884_v41, %v859_v39  ;;  %v1471_v41 = vld [vmem:[%s542_s24 + $0x8] sm:$0xff] }
 0x43c   : > { %v889_v43 = vadd.f32 %v885_v42, %v554_v40  ;;  %v1472_v40 = vld [vmem:[%s542_s24 + $0x10] sm:$0xff]  ;;  %v1470_v42 = vld [vmem:[%s542_s24] sm:$0xff] }
 0x43e   : > { %v891_v44 = vsel %vm584_vm0, %v889_v43, 0.0 }
 0x43f   : > { %892 = vadd.xlane.f32.xlu0 %v891_v44 }
 0x441   : > { %v886_v46 = vpop.f32.mrf.mxu0 }
 0x442   : > { %v887_v47 = vadd.f32 %v886_v46, %v859_v39  ;;  %v1473_v39 = vld [vmem:[%s542_s24 + $0x18] sm:$0xff] }
 0x443   : > { %1074 = vmatpush.bf16.msra.mxu2 %v1473_v39 }
 0x444   : > { %v890_v48 = vadd.f32 %v887_v47, %v555_v45 }
 0x446   : > { %v894_v49 = vsel %vm584_vm0, %v890_v48, 0.0 }
 0x447   : > { %895 = vadd.xlane.f32.xlu1 %v894_v49  ;;  %1075 = vmatpush.bf16.msra.mxu2 %v1472_v40 }
 0x44b   : > { %1076 = vmatpush.bf16.msra.mxu2 %v1471_v41 }
 0x44f   : > { %1077 = vmatpush.bf16.msra.mxu2 %v1470_v42 }
 0x4b2   : > { %v893_v57 = vpop.xlane.xlu0 %892 }
 0x4b3   : > { %v904_v58 = vmul.f32 %v1784_v56, %v893_v57 }
 0x4b5   : > { %v906_v59 = vsub.f32 %v889_v43, %v904_v58  ;;  %v1524_v43 = vld [vmem:[%s549_s29] ss:$0 sm:$0xff] }
 0x4b7   : > { %v908_v60 = vmul.f32 %v906_v59, %v906_v59 }
 0x4b9   : > { %v910_v61 = vsel %vm584_vm0, %v908_v60, 0.0 }
 0x4ba   : > { %v896_v62 = vpop.xlane.xlu1 %895  ;;  %911 = vadd.xlane.f32.xlu2 %v910_v61 }
 0x4bb   : > { %v905_v63 = vmul.f32 %v1784_v56, %v896_v62 }
 0x4bd   : > { %v907_v0 = vsub.f32 %v890_v48, %v905_v63 }
 0x4bf   : > { %v909_v1 = vmul.f32 %v907_v0, %v907_v0 }
 0x4c1   : > { %v913_v2 = vsel %vm584_vm0, %v909_v1, 0.0 }
 0x4c2   : > { %914 = vadd.xlane.f32.xlu0 %v913_v2 }
 0x52d   : > { %v912_v4 = vpop.xlane.xlu2 %911 }
 0x52e   : > { %v916_v5 = vmul.f32 %v912_v4, %v1784_v56  ;;  %v1021_v4 = vperm.slane %v1778_v37, 3 }
 0x530   : > { %v918_v7 = vadd.f32 1e-05, %v916_v5 }
 0x532   : > { %1544 = vrsqrt.f32 %v918_v7  ;;  %vm926_vm7 = vweird.f32 %v918_v7 }
 0x535   : > { %v915_v8 = vpop.xlane.xlu0 %914 }
 0x536   : > { %v917_v9 = vmul.f32 %v915_v8, %v1784_v56 }
 0x538   : > { %v1545_v10 = vpop.eup %1544  ;;  %v919_v11 = vadd.f32 1e-05, %v917_v9 }
 0x539   : > { %v921_v12 = vmul.f32 %v1545_v10, %v918_v7  ;;  %vm927_vm6 = vweird.f32 %v1545_v10 }
 0x53a   : > { %1546 = vrsqrt.f32 %v919_v11  ;;  %vm928_vm8 = vmor %vm926_vm7, %vm927_vm6  ;;  %vm936_vm10 = vweird.f32 %v919_v11 }
 0x53b   : > { %v922_v13 = vmul.f32 %v1545_v10, %v921_v12 }
 0x53d   : > { %v923_v14 = vmul.f32 0.5, %v922_v13 }
 0x53f   : > { %v924_v15 = vsub.f32 1.5, %v923_v14 }
 0x540   : > { %v1547_v16 = vpop.eup %1546 }
 0x541   : > { %v925_v17 = vmul.f32 %v1545_v10, %v924_v15  ;;  %v931_v18 = vmul.f32 %v1547_v16, %v919_v11  ;;  %vm937_vm9 = vweird.f32 %v1547_v16 }
 0x542   : > { %vm938_vm11 = vmor %vm936_vm10, %vm937_vm9 }
 0x543   : > { %v932_v19 = vmul.f32 %v1547_v16, %v931_v18  ;;  %v929_v20 = vsel %vm928_vm8, %v1545_v10, %v925_v17 }
 0x544   : > { %v940_v24 = vmul.f32 %v929_v20, %v906_v59 }
 0x545   : > { %v933_v21 = vmul.f32 0.5, %v932_v19 }
 0x546   : > { %v943_v28 = vmul.f32 %v942_v23, %v940_v24 }
 0x547   : > { %v934_v22 = vsub.f32 1.5, %v933_v21 }
 0x548   : > { %v946_v31 = vadd.f32 %v945_v27, %v943_v28 }
 0x549   : > { %v935_v25 = vmul.f32 %v1547_v16, %v934_v22 }
 0x54b   : > { %v939_v26 = vsel %vm938_vm11, %v1547_v16, %v935_v25 }
 0x54c   : > { %v941_v29 = vmul.f32 %v939_v26, %v907_v0  ;;  %v1478_v26 = vld [vmem:[%s1858_s9] sm:$0xff] }
 0x54e   : > { %v944_v30 = vmul.f32 %v942_v23, %v941_v29  ;;  %v1479_v23 = vld [vmem:[%s1858_s9 + $0x8] sm:$0xff] }
 0x54f   : > { %1166 = vmatpush.bf16.msrb.mxu3 %v1479_v23 }
 0x550   : > { %v947_v32 = vadd.f32 %v945_v27, %v944_v30 }
 0x552   : > { %v948_v33 = vpack.c.bf16 %v947_v32, %v946_v31 }
 0x553   : > { %1167 = vmatpush.bf16.msrb.mxu3 %v1478_v26 }
 0x554   : > { %1410 = vmatmul.msk.bf16.vlgmr.msra.gmra.mxu1 %vm584_vm0, %v948_v33 }
 0x5d1   : > { %v981_v44 = vpop.f32.mrf.mxu1 }
 0x5d2   : > { %v982_v45 = vadd.f32 %v1524_v43, %v981_v44 }
 0x5d4   : > { %v988_v46 = vmul.f32 0.044715, %v982_v45  ;;  %v986_v62 = vmul.f32 0.5, %v982_v45 }
 0x5d6   : > { %v990_v47 = vmul.f32 %v988_v46, %v982_v45 }
 0x5d8   : > { %v992_v48 = vmul.f32 %v990_v47, %v982_v45  ;;  %v1133_v47 = vperm.slane %v1778_v37, 5 }
 0x5d9   : > { %v983_v49 = vpop.f32.mrf.mxu1 }
 0x5da   : > { %v994_v50 = vadd.f32 %v992_v48, %v982_v45  ;;  %v984_v51 = vadd.f32 %v1524_v43, %v983_v49 }
 0x5dc   : > { %v989_v52 = vmul.f32 0.044715, %v984_v51  ;;  %v996_v53 = vmul.f32 0.7978846, %v994_v50  ;;  %v987_v63 = vmul.f32 0.5, %v984_v51 }
 0x5de   : > { %v991_v54 = vmul.f32 %v989_v52, %v984_v51  ;;  %1548 = vtanh.f32 %v996_v53 }
 0x5e0   : > { %v993_v55 = vmul.f32 %v991_v54, %v984_v51  ;;  %v1525_v54 = vld [vmem:[%s1859_s10] ss:$0 sm:$0xff] }
 0x5e2   : > { %v995_v57 = vadd.f32 %v993_v55, %v984_v51 }
 0x5e4   : > { %v997_v58 = vmul.f32 0.7978846, %v995_v57  ;;  %v1549_v59 = vpop.eup %1548 }
 0x5e5   : > { %v1000_v60 = vadd.f32 1.0, %v1549_v59 }
 0x5e6   : > { %1550 = vtanh.f32 %v997_v58 }
 0x5e7   : > { %v1002_v1 = vmul.f32 %v1000_v60, %v986_v62 }
 0x5ec   : > { %v1551_v61 = vpop.eup %1550 }
 0x5ed   : > { %v1001_v0 = vadd.f32 1.0, %v1551_v61 }
 0x5ef   : > { %v1003_v2 = vmul.f32 %v1001_v0, %v987_v63 }
 0x5f1   : > { %v1004_v3 = vpack.c.bf16 %v1003_v2, %v1002_v1 }
 0x5f3   : > { %1078 = vmatmul.bf16.vlgmr.msra.gmra.mxu2 %v1004_v3 }
 0x676   : > { %v1079_v5 = vpop.f32.mrf.mxu2 }
 0x677   : > { %v1080_v6 = vadd.f32 %v1079_v5, %v1021_v4 }
 0x679   : > { %v1084_v7 = vadd.f32 %v1080_v6, %v946_v31 }
 0x67b   : > { %v1086_v8 = vsel %vm584_vm0, %v1084_v7, 0.0 }
 0x67c   : > { %1087 = vadd.xlane.f32.xlu1 %v1086_v8 }
 0x67e   : > { %v1081_v9 = vpop.f32.mrf.mxu2 }
 0x67f   : > { %v1082_v10 = vadd.f32 %v1081_v9, %v1021_v4 }
 0x681   : > { %v1085_v11 = vadd.f32 %v1082_v10, %v947_v32 }
 0x683   : > { %v1089_v12 = vsel %vm584_vm0, %v1085_v11, 0.0 }
 0x684   : > { %1090 = vadd.xlane.f32.xlu0 %v1089_v12 }
 0x6ef   : > { %v1088_v13 = vpop.xlane.xlu1 %1087 }
 0x6f0   : > { %v1092_v14 = vmul.f32 %v1088_v13, %v1784_v56 }
 0x6f2   : > { %v1094_v15 = vsub.f32 %v1084_v7, %v1092_v14 }
 0x6f4   : > { %v1096_v16 = vmul.f32 %v1094_v15, %v1094_v15 }
 0x6f6   : > { %v1098_v17 = vsel %vm584_vm0, %v1096_v16, 0.0 }
 0x6f7   : > { %v1091_v18 = vpop.xlane.xlu0 %1090  ;;  %1099 = vadd.xlane.f32.xlu1 %v1098_v17 }
 0x6f8   : > { %v1093_v19 = vmul.f32 %v1091_v18, %v1784_v56 }
 0x6fa   : > { %v1095_v20 = vsub.f32 %v1085_v11, %v1093_v19 }
 0x6fc   : > { %v1097_v21 = vmul.f32 %v1095_v20, %v1095_v20 }
 0x6fe   : > { %v1101_v22 = vsel %vm584_vm0, %v1097_v21, 0.0 }
 0x6ff   : > { %1102 = vadd.xlane.f32.xlu0 %v1101_v22 }
 0x76a   : > { %v1100_v24 = vpop.xlane.xlu1 %1099 }
 0x76b   : > { %v1104_v25 = vmul.f32 %v1100_v24, %v1784_v56 }
 0x76d   : > { %v1106_v27 = vadd.f32 1e-05, %v1104_v25 }
 0x76f   : > { %1552 = vrsqrt.f32 %v1106_v27  ;;  %vm1114_vm13 = vweird.f32 %v1106_v27 }
 0x772   : > { %v1103_v28 = vpop.xlane.xlu0 %1102 }
 0x773   : > { %v1105_v29 = vmul.f32 %v1103_v28, %v1784_v56  ;;  %v1130_v56 = vperm.slane %v1778_v37, 4 }
 0x775   : > { %v1553_v30 = vpop.eup %1552  ;;  %v1107_v31 = vadd.f32 1e-05, %v1105_v29 }
 0x776   : > { %v1109_v32 = vmul.f32 %v1553_v30, %v1106_v27  ;;  %vm1115_vm12 = vweird.f32 %v1553_v30 }
 0x777   : > { %1554 = vrsqrt.f32 %v1107_v31  ;;  %vm1116_vm14 = vmor %vm1114_vm13, %vm1115_vm12  ;;  %vm1124_vm1 = vweird.f32 %v1107_v31 }
 0x778   : > { %v1110_v33 = vmul.f32 %v1553_v30, %v1109_v32 }
 0x77a   : > { %v1111_v34 = vmul.f32 0.5, %v1110_v33 }
 0x77c   : > { %v1112_v35 = vsub.f32 1.5, %v1111_v34 }
 0x77d   : > { %v1555_v36 = vpop.eup %1554 }
 0x77e   : > { %v1113_v38 = vmul.f32 %v1553_v30, %v1112_v35  ;;  %v1119_v39 = vmul.f32 %v1555_v36, %v1107_v31  ;;  %vm1125_vm15 = vweird.f32 %v1555_v36 }
 0x77f   : > { %vm1126_vm2 = vmor %vm1124_vm1, %vm1125_vm15 }
 0x780   : > { %v1120_v40 = vmul.f32 %v1555_v36, %v1119_v39  ;;  %v1117_v41 = vsel %vm1116_vm14, %v1553_v30, %v1113_v38 }
 0x781   : > { %v1128_v44 = vmul.f32 %v1117_v41, %v1094_v15 }
 0x782   : > { %v1121_v42 = vmul.f32 0.5, %v1120_v40 }
 0x783   : > { %v1131_v48 = vmul.f32 %v1130_v56, %v1128_v44 }
 0x784   : > { %v1122_v43 = vsub.f32 1.5, %v1121_v42 }
 0x785   : > { %v1134_v51 = vadd.f32 %v1133_v47, %v1131_v48 }
 0x786   : > { %v1123_v45 = vmul.f32 %v1555_v36, %v1122_v43 }
 0x788   : > { %v1127_v46 = vsel %vm1126_vm2, %v1555_v36, %v1123_v45 }
 0x789   : > { %v1129_v49 = vmul.f32 %v1127_v46, %v1095_v20 }
 0x78b   : > { %v1132_v50 = vmul.f32 %v1130_v56, %v1129_v49 }
 0x78d   : > { %v1135_v52 = vadd.f32 %v1133_v47, %v1132_v50 }
 0x78f   : > { %v1136_v53 = vpack.c.bf16 %v1135_v52, %v1134_v51 }
 0x791   : > { %1451 = vmatmul.msk.bf16.vlgmr.msrb.gmra.mxu3 %vm584_vm0, %v1136_v53 }
 0x814   : > { %v1169_v55 = vpop.f32.mrf.mxu3 }
 0x815   : > { %v1170_v57 = vadd.f32 %v1525_v54, %v1169_v55 }
 0x819   : > { %1177 = sbr.rel (%p1452_p5) target bundleno = 2081 (0x821), region = 68 }
 0x81c   : > { %v1171_v58 = vpop.f32.mrf.mxu3 }
 0x81d   : > { %v1172_v59 = vadd.f32 %v1525_v54, %v1171_v58 }
 0x81e   : > { %v1619_v37 = vmov 0.0  }
 0x81f   : > { %1178 = vst [vmem:[#allocation3] sm:$0xff] %v1619_v37 }
 0x820   : > { %1179 = vst [vmem:[#allocation3 + $0x8] sm:$0xff] %v1619_v37 }
 0x821 PF: > { %p1453_p6 = scmp.ne.s32.totalorder %s1602_s17, 1 }
 0x826   : > { %v1180_v60 = vld [vmem:[#allocation3] sm:$0xff]  ;;  %1189 = sbr.rel (%p1453_p6) target bundleno = 2101 (0x835), region = 72 }
 0x827   : > { %v1181_v61 = vld [vmem:[#allocation3 + $0x8] sm:$0xff]  ;;  %v1182_v62 = vadd.f32 %v1180_v60, %v1170_v57 }
 0x828   : > { %v1183_v63 = vadd.f32 %v1181_v61, %v1172_v59 }
 0x829   : > { %1184 = vst [vmem:[#allocation3] sm:$0xff] %v1182_v62 }
 0x82a   : > { %1185 = vst [vmem:[#allocation3 + $0x8] sm:$0xff] %v1183_v63 }
 0x830   : > { %v1190_v0 = vld [vmem:[#allocation3] sm:$0xff] }
 0x831   : > { %v1191_v1 = vld [vmem:[#allocation3 + $0x8] sm:$0xff]  ;;  %v1192_v2 = vmul.f32 0.5, %v1190_v0 }
 0x832   : > { %v1193_v3 = vmul.f32 0.5, %v1191_v1 }
 0x833   : > { %1194 = vst [vmem:[#allocation3] sm:$0xff] %v1192_v2 }
 0x834   : > { %1195 = vst [vmem:[#allocation3 + $0x8] sm:$0xff] %v1193_v3 }
 0x835 PF: > { %p1484_p7 = scmp.eq.s32.totalorder %s1356_s20, 1  ;;  %s1206_s23 = sshll.u32 %s1860_s11, 4  ;;  %s1207_s23 = int_to_ptr.hbm [resolvable:$true] %s1206_s23 }
 0x836   : > { %s1620_s15 = smov [#allocation3]   ;;  %s1621_s17 = smov 128  }
 0x837   : > { %s1204_s16 = sshll.u32 %s1620_s15, 4  ;;  %s1622_s24 = smov 8   ;;  %s1205_s16 = int_to_ptr.vmem [resolvable:$true] %s1204_s16 }
 0x838   : > { %1481 = dma.vmem_to_hbm [thread:$0]  (%p1484_p7), %s1205_s16, 256, %s1207_s23, [#allocation4], %s1621_s17, %s1621_s17, %s1622_s24  }
 0x839   : > { %1597 = dma.done.wait (%p1484_p7), [#allocation4], 256  }
 0x83a   : > { %1599 = vsyncadd (%p1484_p7), [#allocation4], 4294967040 }
 0x83b PF: > { %s22_s19 = sadd.s32 1, %s1610_s19   ;;  %s1861_s17 = smov %s1606_s18 }
 0x83c   : > { %p19_p8 = scmp.ge.s32.totalorder %s22_s19, 4   ;;  %s1862_s18 = smov %s1864_s21 }
 0x83e   :  { %21 = sbr.rel (!%p19_p8) target bundleno = 2 (0x2), region = 124 }
 0x843   :  { %1223 = vsyncpa [#allocation4], 1 }
 0x844   :  { %1225 = vsyncpa [#allocation4 + $0x1], 1 }

</bundles_post_ra>
